<compile_context>
chip_gen: v7x
topology: tpu7x:2x2x1
jax: 0.10.0
libtpu: 0.0.40
codegen_flags: <defaults>
</compile_context>

<pallas_src>
import jax
import jax.numpy as jnp
from jax.experimental import pallas as pl
from jax.experimental.pallas import tpu as pltpu


def net_d_kernel(x_ref,
                 w1_ref, b1_ref,
                 w2_ref, b2_ref,
                 w3_ref, b3_ref,
                 w4_ref, b4_ref,
                 w5t_ref, b5_ref,
                 o_ref):
    # x_ref: (2, TILE_B) feature-major f32 input tile.
    x = x_ref[...]
    w1 = w1_ref[...]                                             # (32, 2) f32

    # Layer 1: in_features = 2 -> two VPU broadcast multiply-adds in f32 (K=2 would
    # waste the MXU). Downcast to the MXU operand dtype only in the epilogue.
    h = w1[:, 0:1] * x[0:1, :] + w1[:, 1:2] * x[1:2, :]
    h = jnp.maximum(h + b1_ref[...], 0.0).astype(w2_ref.dtype)   # (32, TILE_B)

    # Layers 2-4: weight-stationary MXU matmuls (bf16 operands by default, f32 accum);
    # batch streams along the lane axis.  Epilogues (bias + ReLU) stay in f32 and fold
    # the downcast for the next layer's operands.
    h = jnp.dot(w2_ref[...], h, preferred_element_type=jnp.float32)
    h = jnp.maximum(h + b2_ref[...], 0.0).astype(w3_ref.dtype)   # (64, TILE_B)

    h = jnp.dot(w3_ref[...], h, preferred_element_type=jnp.float32)
    h = jnp.maximum(h + b3_ref[...], 0.0).astype(w4_ref.dtype)   # (128, TILE_B)

    h = jnp.dot(w4_ref[...], h, preferred_element_type=jnp.float32)
    h = jnp.maximum(h + b4_ref[...], 0.0)                        # (128, TILE_B) f32

    # Layer 5: single output feature -> VPU multiply + sublane reduce (no MXU push).
    w5t = w5t_ref[...]                                           # (128, 1) f32
    out = jnp.sum(w5t * h, axis=0, keepdims=True) + b5_ref[...]  # (1, TILE_B) f32

    o_ref[...] = out.astype(o_ref.dtype)


def _round_up(n, m):
    return (n + m - 1) // m * m


def net_d_forward(x, params, *, tile_b=8192, compute_dtype=jnp.bfloat16,
                  feature_major=False):
    """Forward pass of Net_d.

    x:      (B, 2) f32 row-major (like the PyTorch module), or (2, B) f32 if
            feature_major=True (skips the wrapper-side transpose/pad round trip).
    params: dict with 'w{i}' of shape (out, in) and 'b{i}' of shape (out, 1).
    tile_b: batch tile size (rounded to a multiple of 128; capped so the grid has
            >= 2 steps when the batch allows it -> both v7x TensorCores get work).
            With bf16 intermediates tile_b=8192 fits comfortably under a 32 MiB
            scoped VMEM limit on every generation (v7x has only 64 MiB/TC).
    compute_dtype: MXU operand dtype for layers 2-4 (default bf16; accumulation,
            bias-add, ReLU and the M=1 final layer stay f32).  Use jnp.float32 for
            bit-tight parity with an f32 reference.
    """
    if feature_major:
        x_t = x.astype(jnp.float32)
        B = x.shape[1]
    else:
        B = x.shape[0]
        x_t = jnp.transpose(x).astype(jnp.float32)               # input stays f32

    # Tile selection: multiple of 128, big enough to amortize per-step overhead,
    # small enough that the grid has >= 2 steps (v7x megacore) when possible.
    tile_b = max(128, _round_up(tile_b, 128))
    b128 = _round_up(B, 128)
    if b128 >= 256:
        tile_b = min(tile_b, _round_up(pl.cdiv(b128, 2), 128))
    else:
        tile_b = min(tile_b, b128)
    padded_b = _round_up(B, tile_b)
    num_tiles = padded_b // tile_b

    if padded_b != B:
        x_t = jnp.pad(x_t, ((0, 0), (0, padded_b - B)))

    # MXU operands in compute_dtype; everything touched by the VPU stays f32.
    w1 = params["w1"].astype(jnp.float32)                        # (32, 2)   VPU layer
    w2 = params["w2"].astype(compute_dtype)                      # (64, 32)  MXU
    w3 = params["w3"].astype(compute_dtype)                      # (128, 64) MXU
    w4 = params["w4"].astype(compute_dtype)                      # (128, 128) MXU
    w5t = jnp.transpose(params["w5"]).astype(jnp.float32)        # (128, 1)  VPU layer
    biases = [params[f"b{i}"].astype(jnp.float32) for i in range(1, 6)]

    weight_args = (w1, biases[0], w2, biases[1], w3, biases[2],
                   w4, biases[3], w5t, biases[4])

    const_map = lambda i: (0, 0)   # parameters: same block every grid step -> stay resident
    in_specs = [pl.BlockSpec((2, tile_b), lambda i: (0, i))]
    in_specs += [pl.BlockSpec(a.shape, const_map) for a in weight_args]

    out_t = pl.pallas_call(
        net_d_kernel,
        out_shape=jax.ShapeDtypeStruct((1, padded_b), jnp.float32),
        grid=(num_tiles,),
        in_specs=in_specs,
        out_specs=pl.BlockSpec((1, tile_b), lambda i: (0, i)),
        compiler_params=pltpu.CompilerParams(
            dimension_semantics=("parallel",),   # megacore sharding on v7x; no-op on v5e/v6e
            vmem_limit_bytes=32 * 1024 * 1024,   # safe headroom even on v7x's 64 MiB VMEM/TC
        ),
    )(x_t, *weight_args)

    if feature_major:
        return out_t[:, :B]                       # (1, B)
    return jnp.transpose(out_t)[:B]               # (B, 1)


def init_params(key):
    """PyTorch nn.Linear-style init; weights stored (out, in), biases (out, 1)."""
    sizes = [(2, 32), (32, 64), (64, 128), (128, 128), (128, 1)]
    params = {}
    keys = jax.random.split(key, 2 * len(sizes))
    for i, (fan_in, fan_out) in enumerate(sizes):
        bound = 1.0 / (fan_in ** 0.5)
        w = jax.random.uniform(keys[2 * i], (fan_out, fan_in),
                               minval=-bound, maxval=bound, dtype=jnp.float32)
        b = jax.random.uniform(keys[2 * i + 1], (fan_out, 1),
                               minval=-bound, maxval=bound, dtype=jnp.float32)
        params[f"w{i + 1}"] = w
        params[f"b{i + 1}"] = b
    return params


if __name__ == "__main__":
    key = jax.random.PRNGKey(0)
    pkey, xkey = jax.random.split(key)
    params = init_params(pkey)

    B = 500                      # deliberately not a multiple of 128 -> exercises padding
    x = jax.random.normal(xkey, (B, 2), dtype=jnp.float32)

    # Pure-JAX reference (row-major, matching the PyTorch module).
    ref = x
    for i in range(1, 6):
        ref = jnp.dot(ref, params[f"w{i}"].T,
                      precision=jax.lax.Precision.HIGHEST) + params[f"b{i}"].T
        if i < 5:
            ref = jnp.maximum(ref, 0.0)

    # Default path: bf16 MXU operands, f32 input / accumulation / epilogues.
    out_bf16 = net_d_forward(x, params)
    jax.block_until_ready(out_bf16)
    assert out_bf16.shape == (B, 1)
    assert jnp.allclose(out_bf16, ref, atol=5e-2, rtol=5e-2)

    # f32 operand path (tight tolerance); small tile -> several grid steps.
    # NOTE: in-kernel jnp.dot uses default MXU precision; for bit-level parity with an
    # f32 HIGHEST-precision reference, pass precision explicitly (not needed at 1e-4 here).
    out_f32 = net_d_forward(x, params, tile_b=128, compute_dtype=jnp.float32)
    jax.block_until_ready(out_f32)
    assert out_f32.shape == (B, 1)
    assert jnp.allclose(out_f32, ref, atol=1e-4, rtol=1e-4)

    # Feature-major input path (no wrapper transpose / output transpose).
    out_fm = net_d_forward(jnp.transpose(x), params, feature_major=True)
    jax.block_until_ready(out_fm)
    assert out_fm.shape == (1, B)
    assert jnp.allclose(jnp.transpose(out_fm), ref, atol=5e-2, rtol=5e-2)

    print("KERNEL_OK")
</pallas_src>

<mosaic_0001>
module attributes {stable_mosaic.version = 11 : i64} {
  func.func @net_d_kernel(%arg0: i32, %arg1: memref<2x256xf32, #tpu.memory_space<vmem>>, %arg2: memref<32x2xf32, #tpu.memory_space<vmem>>, %arg3: memref<32x1xf32, #tpu.memory_space<vmem>>, %arg4: memref<64x32xbf16, #tpu.memory_space<vmem>>, %arg5: memref<64x1xf32, #tpu.memory_space<vmem>>, %arg6: memref<128x64xbf16, #tpu.memory_space<vmem>>, %arg7: memref<128x1xf32, #tpu.memory_space<vmem>>, %arg8: memref<128x128xbf16, #tpu.memory_space<vmem>>, %arg9: memref<128x1xf32, #tpu.memory_space<vmem>>, %arg10: memref<128x1xf32, #tpu.memory_space<vmem>>, %arg11: memref<1x1xf32, #tpu.memory_space<vmem>>, %arg12: memref<1x256xf32, #tpu.memory_space<vmem>>) attributes {dimension_semantics = [#tpu.dimension_semantics<parallel>], iteration_bounds = array<i64: 2>, scalar_prefetch = 0 : i64, scratch_operands = 0 : i64, tpu.core_type = #tpu.core_type<tc>, window_params = [{transform_indices = @transform_0, window_bounds = array<i64: 2, 256>}, {pipeline_mode = #tpu.pipeline_mode<synchronous>, transform_indices = @transform_1, window_bounds = array<i64: 32, 2>}, {pipeline_mode = #tpu.pipeline_mode<synchronous>, transform_indices = @transform_2, window_bounds = array<i64: 32, 1>}, {pipeline_mode = #tpu.pipeline_mode<synchronous>, transform_indices = @transform_3, window_bounds = array<i64: 64, 32>}, {pipeline_mode = #tpu.pipeline_mode<synchronous>, transform_indices = @transform_4, window_bounds = array<i64: 64, 1>}, {pipeline_mode = #tpu.pipeline_mode<synchronous>, transform_indices = @transform_5, window_bounds = array<i64: 128, 64>}, {pipeline_mode = #tpu.pipeline_mode<synchronous>, transform_indices = @transform_6, window_bounds = array<i64: 128, 1>}, {pipeline_mode = #tpu.pipeline_mode<synchronous>, transform_indices = @transform_7, window_bounds = array<i64: 128, 128>}, {pipeline_mode = #tpu.pipeline_mode<synchronous>, transform_indices = @transform_8, window_bounds = array<i64: 128, 1>}, {pipeline_mode = #tpu.pipeline_mode<synchronous>, transform_indices = @transform_9, window_bounds = array<i64: 128, 1>}, {pipeline_mode = #tpu.pipeline_mode<synchronous>, transform_indices = @transform_10, window_bounds = array<i64: 1, 1>}, {transform_indices = @transform_11, window_bounds = array<i64: 1, 256>}]} {
    %c0 = arith.constant 0 : index
    %c0_0 = arith.constant 0 : index
    %0 = vector.load %arg1[%c0, %c0_0] : memref<2x256xf32, #tpu.memory_space<vmem>>, vector<2x256xf32>
    %c0_1 = arith.constant 0 : index
    %c0_2 = arith.constant 0 : index
    %1 = vector.load %arg2[%c0_1, %c0_2] : memref<32x2xf32, #tpu.memory_space<vmem>>, vector<32x2xf32>
    %2 = vector.extract_strided_slice %1 {offsets = [0, 0], sizes = [32, 1], strides = [1, 1]} : vector<32x2xf32> to vector<32x1xf32>
    %3 = vector.extract_strided_slice %0 {offsets = [0, 0], sizes = [1, 256], strides = [1, 1]} : vector<2x256xf32> to vector<1x256xf32>
    %4 = vector.broadcast %2 : vector<32x1xf32> to vector<32x256xf32>
    %5 = vector.broadcast %3 : vector<1x256xf32> to vector<32x256xf32>
    %6 = arith.mulf %4, %5 : vector<32x256xf32>
    %7 = vector.extract_strided_slice %1 {offsets = [0, 1], sizes = [32, 1], strides = [1, 1]} : vector<32x2xf32> to vector<32x1xf32>
    %8 = vector.extract_strided_slice %0 {offsets = [1, 0], sizes = [1, 256], strides = [1, 1]} : vector<2x256xf32> to vector<1x256xf32>
    %9 = vector.broadcast %7 : vector<32x1xf32> to vector<32x256xf32>
    %10 = vector.broadcast %8 : vector<1x256xf32> to vector<32x256xf32>
    %11 = arith.mulf %9, %10 : vector<32x256xf32>
    %12 = arith.addf %6, %11 : vector<32x256xf32>
    %c0_3 = arith.constant 0 : index
    %c0_4 = arith.constant 0 : index
    %13 = vector.load %arg3[%c0_3, %c0_4] : memref<32x1xf32, #tpu.memory_space<vmem>>, vector<32x1xf32>
    %14 = vector.broadcast %13 : vector<32x1xf32> to vector<32x256xf32>
    %15 = arith.addf %12, %14 : vector<32x256xf32>
    %cst = arith.constant 0.000000e+00 : f32
    %16 = vector.broadcast %cst : f32 to vector<32x256xf32>
    %17 = arith.maximumf %15, %16 : vector<32x256xf32>
    %18 = arith.truncf %17 : vector<32x256xf32> to vector<32x256xbf16>
    %c0_5 = arith.constant 0 : index
    %c0_6 = arith.constant 0 : index
    %19 = vector.load %arg4[%c0_5, %c0_6] : memref<64x32xbf16, #tpu.memory_space<vmem>>, vector<64x32xbf16>
    %cst_7 = arith.constant dense<0.000000e+00> : vector<64x256xf32>
    %20 = tpu.matmul %19, %18, %cst_7 {dimension_numbers = #tpu.dot_dimension_numbers<[1], [0], [0], [1], [0, 0, 1, 1], [], []>} : vector<64x32xbf16>, vector<32x256xbf16>, vector<64x256xf32> -> vector<64x256xf32>
    %c0_8 = arith.constant 0 : index
    %c0_9 = arith.constant 0 : index
    %21 = vector.load %arg5[%c0_8, %c0_9] : memref<64x1xf32, #tpu.memory_space<vmem>>, vector<64x1xf32>
    %22 = vector.broadcast %21 : vector<64x1xf32> to vector<64x256xf32>
    %23 = arith.addf %20, %22 : vector<64x256xf32>
    %cst_10 = arith.constant 0.000000e+00 : f32
    %24 = vector.broadcast %cst_10 : f32 to vector<64x256xf32>
    %25 = arith.maximumf %23, %24 : vector<64x256xf32>
    %26 = arith.truncf %25 : vector<64x256xf32> to vector<64x256xbf16>
    %c0_11 = arith.constant 0 : index
    %c0_12 = arith.constant 0 : index
    %27 = vector.load %arg6[%c0_11, %c0_12] : memref<128x64xbf16, #tpu.memory_space<vmem>>, vector<128x64xbf16>
    %cst_13 = arith.constant dense<0.000000e+00> : vector<128x256xf32>
    %28 = tpu.matmul %27, %26, %cst_13 {dimension_numbers = #tpu.dot_dimension_numbers<[1], [0], [0], [1], [0, 0, 1, 1], [], []>} : vector<128x64xbf16>, vector<64x256xbf16>, vector<128x256xf32> -> vector<128x256xf32>
    %c0_14 = arith.constant 0 : index
    %c0_15 = arith.constant 0 : index
    %29 = vector.load %arg7[%c0_14, %c0_15] : memref<128x1xf32, #tpu.memory_space<vmem>>, vector<128x1xf32>
    %30 = vector.broadcast %29 : vector<128x1xf32> to vector<128x256xf32>
    %31 = arith.addf %28, %30 : vector<128x256xf32>
    %cst_16 = arith.constant 0.000000e+00 : f32
    %32 = vector.broadcast %cst_16 : f32 to vector<128x256xf32>
    %33 = arith.maximumf %31, %32 : vector<128x256xf32>
    %34 = arith.truncf %33 : vector<128x256xf32> to vector<128x256xbf16>
    %c0_17 = arith.constant 0 : index
    %c0_18 = arith.constant 0 : index
    %35 = vector.load %arg8[%c0_17, %c0_18] : memref<128x128xbf16, #tpu.memory_space<vmem>>, vector<128x128xbf16>
    %cst_19 = arith.constant dense<0.000000e+00> : vector<128x256xf32>
    %36 = tpu.matmul %35, %34, %cst_19 {dimension_numbers = #tpu.dot_dimension_numbers<[1], [0], [0], [1], [0, 0, 1, 1], [], []>} : vector<128x128xbf16>, vector<128x256xbf16>, vector<128x256xf32> -> vector<128x256xf32>
    %c0_20 = arith.constant 0 : index
    %c0_21 = arith.constant 0 : index
    %37 = vector.load %arg9[%c0_20, %c0_21] : memref<128x1xf32, #tpu.memory_space<vmem>>, vector<128x1xf32>
    %38 = vector.broadcast %37 : vector<128x1xf32> to vector<128x256xf32>
    %39 = arith.addf %36, %38 : vector<128x256xf32>
    %cst_22 = arith.constant 0.000000e+00 : f32
    %40 = vector.broadcast %cst_22 : f32 to vector<128x256xf32>
    %41 = arith.maximumf %39, %40 : vector<128x256xf32>
    %c0_23 = arith.constant 0 : index
    %c0_24 = arith.constant 0 : index
    %42 = vector.load %arg10[%c0_23, %c0_24] : memref<128x1xf32, #tpu.memory_space<vmem>>, vector<128x1xf32>
    %43 = vector.broadcast %42 : vector<128x1xf32> to vector<128x256xf32>
    %44 = arith.mulf %43, %41 : vector<128x256xf32>
    %cst_25 = arith.constant dense<0.000000e+00> : vector<256xf32>
    %45 = vector.multi_reduction <add>, %44, %cst_25 [0] : vector<128x256xf32> to vector<256xf32>
    %46 = vector.shape_cast %45 : vector<256xf32> to vector<1x256xf32>
    %c0_26 = arith.constant 0 : index
    %c0_27 = arith.constant 0 : index
    %47 = vector.load %arg11[%c0_26, %c0_27] : memref<1x1xf32, #tpu.memory_space<vmem>>, vector<1x1xf32>
    %48 = vector.broadcast %47 : vector<1x1xf32> to vector<1x256xf32>
    %49 = arith.addf %46, %48 : vector<1x256xf32>
    %c0_28 = arith.constant 0 : index
    %c0_29 = arith.constant 0 : index
    %50 = vector.load %arg12[%c0_28, %c0_29] : memref<1x256xf32, #tpu.memory_space<vmem>>, vector<1x256xf32>
    tpu.vector_store %arg12[%c0_28, %c0_29], %49 {strides = array<i32>} : memref<1x256xf32, #tpu.memory_space<vmem>>, vector<1x256xf32>,
    return
  }
  func.func @transform_0(%arg0: i32) -> (i32, i32) {
    %c0_i32 = arith.constant 0 : i32
    %c0_i32_0 = arith.constant 0 : i32
    return %c0_i32, %arg0 : i32, i32
  }
  func.func @transform_1(%arg0: i32) -> (i32, i32) {
    %c0_i32 = arith.constant 0 : i32
    %c0_i32_0 = arith.constant 0 : i32
    %c0_i32_1 = arith.constant 0 : i32
    return %c0_i32, %c0_i32_0 : i32, i32
  }
  func.func @transform_2(%arg0: i32) -> (i32, i32) {
    %c0_i32 = arith.constant 0 : i32
    %c0_i32_0 = arith.constant 0 : i32
    %c0_i32_1 = arith.constant 0 : i32
    return %c0_i32, %c0_i32_0 : i32, i32
  }
  func.func @transform_3(%arg0: i32) -> (i32, i32) {
    %c0_i32 = arith.constant 0 : i32
    %c0_i32_0 = arith.constant 0 : i32
    %c0_i32_1 = arith.constant 0 : i32
    return %c0_i32, %c0_i32_0 : i32, i32
  }
  func.func @transform_4(%arg0: i32) -> (i32, i32) {
    %c0_i32 = arith.constant 0 : i32
    %c0_i32_0 = arith.constant 0 : i32
    %c0_i32_1 = arith.constant 0 : i32
    return %c0_i32, %c0_i32_0 : i32, i32
  }
  func.func @transform_5(%arg0: i32) -> (i32, i32) {
    %c0_i32 = arith.constant 0 : i32
    %c0_i32_0 = arith.constant 0 : i32
    %c0_i32_1 = arith.constant 0 : i32
    return %c0_i32, %c0_i32_0 : i32, i32
  }
  func.func @transform_6(%arg0: i32) -> (i32, i32) {
    %c0_i32 = arith.constant 0 : i32
    %c0_i32_0 = arith.constant 0 : i32
    %c0_i32_1 = arith.constant 0 : i32
    return %c0_i32, %c0_i32_0 : i32, i32
  }
  func.func @transform_7(%arg0: i32) -> (i32, i32) {
    %c0_i32 = arith.constant 0 : i32
    %c0_i32_0 = arith.constant 0 : i32
    %c0_i32_1 = arith.constant 0 : i32
    return %c0_i32, %c0_i32_0 : i32, i32
  }
  func.func @transform_8(%arg0: i32) -> (i32, i32) {
    %c0_i32 = arith.constant 0 : i32
    %c0_i32_0 = arith.constant 0 : i32
    %c0_i32_1 = arith.constant 0 : i32
    return %c0_i32, %c0_i32_0 : i32, i32
  }
  func.func @transform_9(%arg0: i32) -> (i32, i32) {
    %c0_i32 = arith.constant 0 : i32
    %c0_i32_0 = arith.constant 0 : i32
    %c0_i32_1 = arith.constant 0 : i32
    return %c0_i32, %c0_i32_0 : i32, i32
  }
  func.func @transform_10(%arg0: i32) -> (i32, i32) {
    %c0_i32 = arith.constant 0 : i32
    %c0_i32_0 = arith.constant 0 : i32
    %c0_i32_1 = arith.constant 0 : i32
    return %c0_i32, %c0_i32_0 : i32, i32
  }
  func.func @transform_11(%arg0: i32) -> (i32, i32) {
    %c0_i32 = arith.constant 0 : i32
    %c0_i32_0 = arith.constant 0 : i32
    return %c0_i32, %arg0 : i32, i32
  }
}

</mosaic_0001>

<bundles_post_ra>
// kernel: tpu_custom_call.1
= control target key start
LH: loop header
LB: loop body
LE: loop exit
PB: predicated region body
PF: predicated region fallthrough
CT: control target
= control target key end

     0   :  { %s2338_s0 = inlined_call_operand.vmem [shape: f32[2,512], index: 0, kind: input, shape index: {}]   ;;  %s2339_s1 = inlined_call_operand.vmem [shape: f32[32,2], index: 1, kind: input, shape index: {}]   ;;  %s2340_s2 = inlined_call_operand.vmem [shape: f32[32,1], index: 2, kind: input, shape index: {}]   ;;  %s2341_s3 = inlined_call_operand.vmem [shape: bf16[64,32], index: 3, kind: input, shape index: {}]   ;;  %s2342_s4 = inlined_call_operand.vmem [shape: f32[64,1], index: 4, kind: input, shape index: {}]   ;;  %s2343_s5 = inlined_call_operand.vmem [shape: bf16[128,64], index: 5, kind: input, shape index: {}]   ;;  %s2344_s6 = inlined_call_operand.vmem [shape: f32[128,1], index: 6, kind: input, shape index: {}]   ;;  %s2345_s7 = inlined_call_operand.vmem [shape: bf16[128,128], index: 7, kind: input, shape index: {}]   ;;  %s2346_s8 = inlined_call_operand.vmem [shape: f32[128,1], index: 8, kind: input, shape index: {}]   ;;  %s2347_s9 = inlined_call_operand.vmem [shape: f32[128,1], index: 9, kind: input, shape index: {}]   ;;  %s2348_s10 = inlined_call_operand.<no memory space> [shape: f32[1,1], index: 10, kind: input, shape index: {}]   ;;  %s2349_s11 = inlined_call_operand.hbm [shape: f32[1,512], index: 11, kind: output, shape index: {}]  }
   0x1   :  { %v16_v0 = vstv %s2348_s10 }
   0x2   :  { %17 = vst [vmem:[#allocation2] sm:$0x1] %v16_v0 }
   0x3   :  { %18 = vsyncpa [#allocation4], 0 }
   0x4   :  { %20 = vsyncpa [#allocation4 + $0x1], 0  ;;  %s1905_s19 = smov 0   ;;  %s1907_s20 = smov 0  }
   0x5   :  { %s1909_s21 = smov 0   ;;  %s1911_s22 = smov 0  }
   0x6 LB: > { %s1926_s10 = sadd.s32 4294967295, %s1836_s22   ;;  %s1645_s23 = sadd.s32 4294967294, %s1836_s22   ;;  %s1836_s22 = sphi %s1911_s22, %s2355_s22   ;;  %s1832_s21 = sphi %s1909_s21, %s2354_s21   ;;  %s1828_s20 = sphi %s1907_s20, %s2353_s20   ;;  %s1824_s19 = sphi %s1905_s19, %s2352_s19  }
   0x7   : > { %s1930_s24 = sadd.s32 1, %s1836_s22   ;;  %s269_s25 = sadd.s32 1, %s1832_s21 }
   0x8   : > { %s266_s26 = ssub.s32 %s1836_s22, %s1930_s24  ;;  %p279_p0 = scmp.ne.s32.totalorder %s1832_s21, %s1828_s20 }
   0x9   : > { %p267_p1 = scmp.eq.s32.totalorder %s266_s26, 0  ;;  %p280_p2 = scmp.eq.s32.totalorder %s1926_s10, 1 }
   0xa   : > { %p285_p3 = scmp.ne.s32.totalorder %s1828_s20, %s1824_s19  ;;  %p286_p4 = scmp.eq.s32.totalorder %s1645_s23, 1 }
   0xb   : > { %s1941_s27 = scalar_select %p267_p1, %s1832_s21, %s269_s25  }
   0xc   : > { %p1943_p5 = por %p280_p2, %p279_p0  ;;  %p1947_p6 = por %p286_p4, %p285_p3 }
   0xd   : > { %p1648_p7 = scmp.ge.s32.totalorder %s1836_s22, 1  ;;  %p343_p8 = scmp.lt.s32.totalorder %s1836_s22, 3 }
   0xf   : > { %p344_p9 = pnand %p1648_p7, %p343_p8 }
  0x10   : > { %v394_v1 = vld [vmem:[%s2339_s1 + $0x10] sm:$0xff] (!%p344_p9)  ;;  %v392_v2 = vld [vmem:[%s2339_s1] sm:$0xff] (!%p344_p9)  ;;  %v1838_v3 = vmov (!%p344_p9), 1   ;;  %v393_v4 = vld [vmem:[%s2339_s1 + $0x8] sm:$0xff] (!%p344_p9)  ;;  %v1839_v5 = vmov (!%p344_p9), 0   ;;  %s1650_s30 = sshll.u32 (!%p344_p9), %s1926_s10, 1  ;;  %v417_v62 = vlaneseq (!%p344_p9) }
  0x11   : > { %347 = sbr.rel (%p344_p9) target bundleno = 1022 (0x3fe), region = 64  ;;  %1750 = vset.pattern.permute.xlu0 (!%p344_p9), %v1838_v3  ;;  %1748 = vset.pattern.permute.xlu1 (!%p344_p9), %v1838_v3  ;;  %v395_v6 = vld [vmem:[%s2339_s1 + $0x18] sm:$0xff] (!%p344_p9)  ;;  %v494_v7 = vld [vmem:[%s2340_s2 + $0x8] sm:$0xff] (!%p344_p9)  ;;  %v493_v8 = vld [vmem:[%s2340_s2] sm:$0xff] (!%p344_p9)  ;;  %p384_p10 = scmp.lt.s32.totalorder (!%p344_p9), %s1650_s30, 3  ;;  %vm613_vm0 = vcmask (!%p344_p9), 261120  }
  0x12   : > { %452 = vperm.xlu0 (!%p344_p9), %1750, %v394_v1   ;;  %444 = vperm.xlu1 (!%p344_p9), %1748, %v392_v2   ;;  %v545_v9 = vld [vmem:[%s2342_s4] sm:$0xff] (!%p344_p9)  ;;  %v495_v10 = vld [vmem:[%s2340_s2 + $0x10] sm:$0xff] (!%p344_p9)  ;;  %v496_v12 = vld [vmem:[%s2340_s2 + $0x18] sm:$0xff] (!%p344_p9)  ;;  %vm875_vm1 = vcmask (!%p344_p9), 523264   ;;  %s1689_s26 = sshll.u32 (!%p344_p9), %s1926_s10, 5  ;;  %vm1568_vm2 = vcmp.lt.s32.totalorder (!%p344_p9), %v417_v62, 256 }
  0x13   : > { %658 = vmatprep.mubr.bf16.mxu0 (!%p344_p9), %v1839_v5  ;;  %932 = vmatprep.mubr.bf16.mxu1 (!%p344_p9), %v1839_v5  ;;  %v547_v11 = vld [vmem:[%s2342_s4 + $0x10] sm:$0xff] (!%p344_p9)  ;;  %v549_v13 = vld [vmem:[%s2342_s4 + $0x20] sm:$0xff] (!%p344_p9)  ;;  %v546_v14 = vld [vmem:[%s2342_s4 + $0x8] sm:$0xff] (!%p344_p9)  ;;  %s2296_s16 = scalar_lea.hbm (!%p344_p9), %s2349_s11, %s1689_s26  ;;  %s1841_s10 = smov (!%p344_p9), [#allocation3]  }
  0x14   : > { %v551_v15 = vld [vmem:[%s2342_s4 + $0x30] sm:$0xff] (!%p344_p9)  ;;  %v548_v16 = vld [vmem:[%s2342_s4 + $0x18] sm:$0xff] (!%p344_p9)  ;;  %v739_v17 = vld [vmem:[%s2344_s6] sm:$0xff] (!%p344_p9) }
  0x15   : > { %v550_v18 = vld [vmem:[%s2342_s4 + $0x28] sm:$0xff] (!%p344_p9)  ;;  %v741_v19 = vld [vmem:[%s2344_s6 + $0x10] sm:$0xff] (!%p344_p9)  ;;  %v552_v20 = vld [vmem:[%s2342_s4 + $0x38] sm:$0xff] (!%p344_p9) }
  0x16   : > { %1751 = vset.pattern.permute.xlu0 (!%p344_p9), %v1839_v5  ;;  %448 = vperm.xlu1 (!%p344_p9), %1748, %v393_v4   ;;  %v743_v21 = vld [vmem:[%s2344_s6 + $0x20] sm:$0xff] (!%p344_p9)  ;;  %v740_v22 = vld [vmem:[%s2344_s6 + $0x8] sm:$0xff] (!%p344_p9)  ;;  %v745_v23 = vld [vmem:[%s2344_s6 + $0x30] sm:$0xff] (!%p344_p9) }
  0x17   : > { %398 = vperm.xlu0 (!%p344_p9), %1751, %v392_v2   ;;  %v742_v24 = vld [vmem:[%s2344_s6 + $0x18] sm:$0xff] (!%p344_p9)  ;;  %v747_v25 = vld [vmem:[%s2344_s6 + $0x40] sm:$0xff] (!%p344_p9)  ;;  %v744_v26 = vld [vmem:[%s2344_s6 + $0x28] sm:$0xff] (!%p344_p9) }
  0x18   : > { %v749_v27 = vld [vmem:[%s2344_s6 + $0x50] sm:$0xff]  ;;  %v746_v28 = vld [vmem:[%s2344_s6 + $0x38] sm:$0xff]  ;;  %v751_v29 = vld [vmem:[%s2344_s6 + $0x60] sm:$0xff]  ;;  %s2357_s30 = smov (!%p384_p10, %s1650_s30), 3 }
  0x19   : > { %v748_v30 = vld [vmem:[%s2344_s6 + $0x48] sm:$0xff]  ;;  %v753_v31 = vld [vmem:[%s2344_s6 + $0x70] sm:$0xff]  ;;  %v750_v32 = vld [vmem:[%s2344_s6 + $0x58] sm:$0xff]  ;;  %s1651_s12 = sshll.u32 %s2357_s30, 1  ;;  %s380_s30 = sand.u32 1, %s1828_s20  }
  0x1a   : > { %1749 = vset.pattern.permute.xlu1 %v1839_v5  ;;  %v1077_v33 = vld [vmem:[%s2346_s8] sm:$0xff]  ;;  %v752_v34 = vld [vmem:[%s2344_s6 + $0x68] sm:$0xff]  ;;  %v1079_v35 = vld [vmem:[%s2346_s8 + $0x10] sm:$0xff]  ;;  %s387_s23 = scalar_lea.vmem %s2338_s0, %s1651_s12  ;;  %s1649_s25 = sshll.u32 %s380_s30, 1 }
  0x1b   : > { %403 = vperm.xlu0 %1751, %v393_v4   ;;  %413 = vperm.xlu1 %1749, %v395_v6   ;;  %v754_v36 = vld [vmem:[%s2344_s6 + $0x78] sm:$0xff]  ;;  %v1366_v37 = vld [vmem:[%s2347_s9] sm:$0xff]  ;;  %v1078_v38 = vld [vmem:[%s2346_s8 + $0x8] sm:$0xff]  ;;  %s382_s12 = scalar_lea.vmem [#allocation3], %s1649_s25  ;;  %s1572_s17 = scalar_lea.sflag [#allocation4], %s380_s30 }
  0x1c   : > { %v1081_v39 = vld [vmem:[%s2346_s8 + $0x20] sm:$0xff]  ;;  %v1080_v40 = vld [vmem:[%s2346_s8 + $0x18] sm:$0xff]  ;;  %v1082_v41 = vld [vmem:[%s2346_s8 + $0x28] sm:$0xff]  ;;  %s1586_s13 = sshll.u32 %s382_s12, 4  ;;  %s2298_s13 = int_to_ptr.vmem [resolvable:$true] %s1586_s13 }
  0x1d   : > { %v1367_v42 = vld [vmem:[%s2347_s9 + $0x8] sm:$0xff]  ;;  %v1083_v43 = vld [vmem:[%s2346_s8 + $0x30] sm:$0xff]  ;;  %v1084_v45 = vld [vmem:[%s2346_s8 + $0x38] sm:$0xff]  ;;  %s1774_s18 = scalar_lea.vmem %s2298_s13, 32 }
  0x1e   : > { %v1368_v44 = vld [vmem:[%s2347_s9 + $0x10] sm:$0xff]  ;;  %v1369_v46 = vld [vmem:[%s2347_s9 + $0x18] sm:$0xff]  ;;  %v1085_v47 = vld [vmem:[%s2346_s8 + $0x40] sm:$0xff]  ;;  %p1775_p11 = scmp.ne.s32.totalorder %s2298_s13, %s1774_s18 }
  0x1f   : > { %408 = vperm.xlu0 %1751, %v394_v1   ;;  %1752 = vset.pattern.permute.xlu1 %v1838_v3  ;;  %v1370_v48 = vld [vmem:[%s2347_s9 + $0x20] sm:$0xff]  ;;  %v1086_v49 = vld [vmem:[%s2346_s8 + $0x48] sm:$0xff]  ;;  %v1087_v51 = vld [vmem:[%s2346_s8 + $0x50] sm:$0xff]  ;;  %v2143_v1 = vshrl.u32 %v417_v62, 7 }
  0x20   : > { %456 = vperm.xlu1 %1752, %v395_v6   ;;  %v1371_v50 = vld [vmem:[%s2347_s9 + $0x28] sm:$0xff]  ;;  %v1372_v52 = vld [vmem:[%s2347_s9 + $0x30] sm:$0xff]  ;;  %v1088_v53 = vld [vmem:[%s2346_s8 + $0x58] sm:$0xff]  ;;  %p1776_p12 = pnand %p1775_p11, %p1943_p5 }
  0x21   : > { %v1373_v54 = vld [vmem:[%s2347_s9 + $0x38] sm:$0xff]  ;;  %v1089_v55 = vld [vmem:[%s2346_s8 + $0x60] sm:$0xff]  ;;  %v1090_v57 = vld [vmem:[%s2346_s8 + $0x68] sm:$0xff]  ;;  %v2152_v6 = vsub.s32 0, %v2143_v1 }
  0x22   : > { %v1374_v56 = vld [vmem:[%s2347_s9 + $0x40] sm:$0xff]  ;;  %v1375_v58 = vld [vmem:[%s2347_s9 + $0x48] sm:$0xff]  ;;  %v1091_v59 = vld [vmem:[%s2346_s8 + $0x70] sm:$0xff]  ;;  %p1777_p13 = pneg %p1776_p12 }
  0x23   : > { %504 = vperm.xlu0 %1751, %v494_v7   ;;  %v1376_v60 = vld [vmem:[%s2347_s9 + $0x50] sm:$0xff]  ;;  %v1092_v61 = vld [vmem:[%s2346_s8 + $0x78] sm:$0xff]  ;;  %v1378_v4 = vld [vmem:[%s2347_s9 + $0x60] sm:$0xff]  ;;  %v423_v7 = vsub.s32 2, %v2143_v1 }
  0x24   : > { %1753 = vset.pattern.permute.xlu1 %v1839_v5  ;;  %v1377_v63 = vld [vmem:[%s2347_s9 + $0x58] sm:$0xff]  ;;  %v1380_v0 = vld [vmem:[%s2347_s9 + $0x70] sm:$0xff] }
  0x25   : > { %499 = vperm.xlu1 %1753, %v493_v8   ;;  %v1536_v8 = vld [vmem:[#allocation2] sm:$0x1] }
  0x27   : > { %555 = vperm.xlu0 %1751, %v545_v9   ;;  %v461_v9 = vsub.s32 1, %v2143_v1 }
  0x29   : > { %509 = vperm.xlu1 %1753, %v495_v10   ;;  %v465_v10 = vsub.s32 3, %v2143_v1 }
  0x2b   : > { %565 = vperm.xlu0 %1751, %v547_v11  }
  0x2d   : > { %514 = vperm.xlu1 %1753, %v496_v12   ;;  %v391_v12 = vld [vmem:[%s387_s23] sm:$0xf]  ;;  %s1778_s23 = sshll.u32 %s1841_s10, 4  ;;  %s1779_s23 = int_to_ptr.vmem [resolvable:$false] %s1778_s23 }
  0x2e   : > { %s1780_s25 = scalar_lea.vmem %s1779_s23, 64  ;;  %p1781_p0 = scmp.lt.s32.totalorder %s2298_s13, %s1779_s23 }
  0x2f   : > { %575 = vperm.xlu0 %1751, %v549_v13   ;;  %p1782_p1 = scmp.lt.s32.totalorder %s1780_s25, %s1774_s18 }
  0x31   : > { %560 = vperm.xlu1 %1753, %v546_v14   ;;  %v1379_v14 = vld [vmem:[%s2347_s9 + $0x68] sm:$0xff]  ;;  %p1783_p2 = por %p1782_p1, %p1781_p0 }
  0x33   : > { %585 = vperm.xlu0 %1751, %v551_v15   ;;  %v420_v15 = vrot.slane %v391_v12, %v2152_v6  ;;  %p1784_p3 = pnand %p1783_p2, %p1777_p13 }
  0x35   : > { %570 = vperm.xlu1 %1753, %v548_v16   ;;  %v424_v16 = vrot.slane %v391_v12, %v423_v7 }
  0x37   : > { %757 = vperm.xlu0 %1751, %v739_v17   ;;  %v462_v17 = vrot.slane %v391_v12, %v461_v9 }
  0x39   : > { %580 = vperm.xlu1 %1753, %v550_v18   ;;  %v466_v18 = vrot.slane %v391_v12, %v465_v10 }
  0x3b   : > { %767 = vperm.xlu0 %1751, %v741_v19  }
  0x3d   : > { %590 = vperm.xlu1 %1753, %v552_v20  }
  0x3f   : > { %777 = vperm.xlu0 %1751, %v743_v21   ;;  %v1381_v21 = vld [vmem:[%s2347_s9 + $0x78] sm:$0xff] }
  0x41   : > { %762 = vperm.xlu1 %1753, %v740_v22   ;;  %v430_v22 = vrot.slane %v420_v15, %v2152_v6 }
  0x43   : > { %787 = vperm.xlu0 %1751, %v745_v23   ;;  %v434_v23 = vrot.slane %v424_v16, %v2152_v6  ;;  %v1754_v16 = vld [vmem:[%s2341_s3] sm:$0xff]  }
  0x45   : > { %772 = vperm.xlu1 %1753, %v742_v24   ;;  %v472_v24 = vrot.slane %v462_v17, %v461_v9  ;;  %v1755_v17 = vld [vmem:[%s2341_s3 + $0x8] sm:$0xff]  }
  0x47   : > { %797 = vperm.xlu0 %1751, %v747_v25   ;;  %v476_v25 = vrot.slane %v466_v18, %v461_v9  ;;  %v1756_v18 = vld [vmem:[%s2341_s3 + $0x10] sm:$0xff]  }
  0x49   : > { %782 = vperm.xlu1 %1753, %v744_v26  }
  0x4b   : > { %807 = vperm.xlu0 %1751, %v749_v27  }
  0x4d   : > { %792 = vperm.xlu1 %1753, %v746_v28  }
  0x4f   : > { %817 = vperm.xlu0 %1751, %v751_v29  }
  0x51   : > { %802 = vperm.xlu1 %1753, %v748_v30  }
  0x53   : > { %827 = vperm.xlu0 %1751, %v753_v31  }
  0x55   : > { %812 = vperm.xlu1 %1753, %v750_v32  }
  0x57   : > { %1095 = vperm.xlu0 %1751, %v1077_v33  }
  0x59   : > { %822 = vperm.xlu1 %1753, %v752_v34  }
  0x5b   : > { %1105 = vperm.xlu0 %1751, %v1079_v35  }
  0x5d   : > { %832 = vperm.xlu1 %1753, %v754_v36  }
  0x5f   : > { %1384 = vperm.xlu0 %1751, %v1366_v37  }
  0x61   : > { %1100 = vperm.xlu1 %1753, %v1078_v38  }
  0x63   : > { %1115 = vperm.xlu0 %1751, %v1081_v39  }
  0x65   : > { %1110 = vperm.xlu1 %1753, %v1080_v40  }
  0x67   : > { %1120 = vperm.xlu0 %1751, %v1082_v41  }
  0x69   : > { %1389 = vperm.xlu1 %1753, %v1367_v42  }
  0x6b   : > { %1125 = vperm.xlu0 %1751, %v1083_v43  }
  0x6d   : > { %1394 = vperm.xlu1 %1753, %v1368_v44  }
  0x6f   : > { %1130 = vperm.xlu0 %1751, %v1084_v45  }
  0x71   : > { %1399 = vperm.xlu1 %1753, %v1369_v46  }
  0x73   : > { %1135 = vperm.xlu0 %1751, %v1085_v47  }
  0x75   : > { %1404 = vperm.xlu1 %1753, %v1370_v48  }
  0x77   : > { %1140 = vperm.xlu0 %1751, %v1086_v49  }
  0x79   : > { %1409 = vperm.xlu1 %1753, %v1371_v50  }
  0x7b   : > { %1145 = vperm.xlu0 %1751, %v1087_v51  }
  0x7d   : > { %1414 = vperm.xlu1 %1753, %v1372_v52  }
  0x7f   : > { %1150 = vperm.xlu0 %1751, %v1088_v53  }
  0x81   : > { %1419 = vperm.xlu1 %1753, %v1373_v54  }
  0x83   : > { %1155 = vperm.xlu0 %1751, %v1089_v55  }
  0x85   : > { %1424 = vperm.xlu1 %1753, %v1374_v56  }
  0x87   : > { %1160 = vperm.xlu0 %1751, %v1090_v57  }
  0x89   : > { %1429 = vperm.xlu1 %1753, %v1375_v58  }
  0x8b   : > { %1165 = vperm.xlu0 %1751, %v1091_v59  }
  0x8d   : > { %1434 = vperm.xlu1 %1753, %v1376_v60  }
  0x8f   : > { %1170 = vperm.xlu0 %1751, %v1092_v61  }
  0x91   : > { %1439 = vperm.xlu1 %1753, %v1377_v63   ;;  %v445_v2 = vpop.permute.xlu1 %444  ;;  %v453_v3 = vpop.permute.xlu0 %452 }
  0x92   : > { %v477_v34 = vmul.f32 %v472_v24, %v445_v2  ;;  %v478_v35 = vmul.f32 %v476_v25, %v445_v2  ;;  %v481_v48 = vmul.f32 %v472_v24, %v453_v3  ;;  %v482_v49 = vmul.f32 %v476_v25, %v453_v3 }
  0x93   : > { %1454 = vperm.xlu0 %1751, %v1380_v0  }
  0x95   : > { %1444 = vperm.xlu1 %1753, %v1378_v4   ;;  %v449_v11 = vpop.permute.xlu1 %448 }
  0x96   : > { %v399_v13 = vpop.permute.xlu0 %398  ;;  %v479_v29 = vmul.f32 %v472_v24, %v449_v11  ;;  %v480_v30 = vmul.f32 %v476_v25, %v449_v11 }
  0x97   : > { %1539 = vperm.xlu0 %1751, %v1536_v8   ;;  %v435_v31 = vmul.f32 %v430_v22, %v399_v13  ;;  %v436_v32 = vmul.f32 %v434_v23, %v399_v13 }
  0x99   : > { %1449 = vperm.xlu1 %1753, %v1379_v14   ;;  %v485_v41 = vadd.f32 %v477_v34, %v435_v31  ;;  %v486_v42 = vadd.f32 %v478_v35, %v436_v32 }
  0x9a   : > { %v404_v19 = vpop.permute.xlu0 %403  ;;  %v414_v20 = vpop.permute.xlu1 %413 }
  0x9b   : > { %v437_v26 = vmul.f32 %v430_v22, %v404_v19  ;;  %v438_v27 = vmul.f32 %v434_v23, %v404_v19  ;;  %v441_v56 = vmul.f32 %v430_v22, %v414_v20  ;;  %v442_v57 = vmul.f32 %v434_v23, %v414_v20  ;;  %v1757_v19 = vld [vmem:[%s2341_s3 + $0x18] sm:$0xff]  }
  0x9d   : > { %1459 = vperm.xlu1 %1753, %v1381_v21   ;;  %v487_v36 = vadd.f32 %v479_v29, %v437_v26  ;;  %v488_v37 = vadd.f32 %v480_v30, %v438_v27 }
  0x9e   : > { %v409_v28 = vpop.permute.xlu0 %408 }
  0x9f   : > { %v457_v33 = vpop.permute.xlu1 %456  ;;  %v439_v44 = vmul.f32 %v430_v22, %v409_v28  ;;  %v440_v45 = vmul.f32 %v434_v23, %v409_v28 }
  0xa0   : > { %v483_v50 = vmul.f32 %v472_v24, %v457_v33  ;;  %v484_v51 = vmul.f32 %v476_v25, %v457_v33 }
  0xa1   : > { %v489_v59 = vadd.f32 %v481_v48, %v439_v44  ;;  %v490_v60 = vadd.f32 %v482_v49, %v440_v45 }
  0xa2   : > { %v505_v38 = vpop.permute.xlu0 %504  ;;  %v491_v4 = vadd.f32 %v483_v50, %v441_v56  ;;  %v492_v7 = vadd.f32 %v484_v51, %v442_v57 }
  0xa3   : > { %v519_v39 = vadd.f32 %v505_v38, %v487_v36  ;;  %v520_v40 = vadd.f32 %v505_v38, %v488_v37 }
  0xa4   : > { %v500_v43 = vpop.permute.xlu1 %499 }
  0xa5   : > { %v517_v46 = vadd.f32 %v500_v43, %v485_v41  ;;  %v518_v47 = vadd.f32 %v500_v43, %v486_v42  ;;  %v527_v52 = vmax.f32 %v519_v39, 0.0  ;;  %v528_v55 = vmax.f32 %v520_v40, 0.0 }
  0xa6   : > { %v556_v20 = vpop.permute.xlu0 %555 }
  0xa7   : > { %v525_v53 = vmax.f32 %v517_v46, 0.0  ;;  %v526_v54 = vmax.f32 %v518_v47, 0.0 }
  0xa8   : > { %v510_v58 = vpop.permute.xlu1 %509 }
  0xa9   : > { %v534_v61 = vpack.c.bf16 %v528_v55, %v526_v54  ;;  %v533_v63 = vpack.c.bf16 %v527_v52, %v525_v53  ;;  %v521_v0 = vadd.f32 %v510_v58, %v489_v59  ;;  %v522_v2 = vadd.f32 %v510_v58, %v490_v60 }
  0xaa   : > { %v566_v35 = vpop.permute.xlu0 %565 }
  0xab   : > { %626 = vmatprep.subr.bf16.mxu0 %v534_v61  ;;  %v529_v10 = vmax.f32 %v521_v0, 0.0  ;;  %v530_v11 = vmax.f32 %v522_v2, 0.0 }
  0xac   : > { %v515_v8 = vpop.permute.xlu1 %514  ;;  %627 = vmatpush1.bf16.msra.mxu0 %v533_v63 }
  0xad   : > { %v523_v3 = vadd.f32 %v515_v8, %v491_v4  ;;  %v524_v9 = vadd.f32 %v515_v8, %v492_v7 }
  0xae   : > { %v576_v51 = vpop.permute.xlu0 %575 }
  0xaf   : > { %v531_v12 = vmax.f32 %v523_v3, 0.0  ;;  %v532_v13 = vmax.f32 %v524_v9, 0.0 }
  0xb0   : > { %v561_v24 = vpop.permute.xlu1 %560 }
  0xb1   : > { %v536_v14 = vpack.c.bf16 %v532_v13, %v530_v11  ;;  %v535_v15 = vpack.c.bf16 %v531_v12, %v529_v10 }
  0xb2   : > { %v586_v8 = vpop.permute.xlu0 %585 }
  0xb3   : > { %628 = vmatprep.subr.bf16.mxu0 %v536_v14 }
  0xb4   : > { %629 = vmatpush1.bf16.msra.mxu0 %v535_v15  ;;  %v571_v40 = vpop.permute.xlu1 %570 }
  0xb7   : > { %1656 = vmatmul.mubr.msk.bf16.vlgmr.msra.gmra.mrb[0].mxu0 %vm613_vm0, %v1754_v16 }
  0xb8   : > { %668 = vmatprep.mubr.bf16.mxu0 %v1839_v5  ;;  %v581_v56 = vpop.permute.xlu1 %580 }
  0xbc   : > { %v591_v12 = vpop.permute.xlu1 %590 }
  0xbf   : > { %1657 = vmatmul.mubr.msk.bf16.gmra.mrb[4].mxu0 %vm613_vm0, %v1755_v17 }
  0xc0   : > { %678 = vmatprep.mubr.bf16.mxu0 %v1839_v5 }
  0xc7   : > { %1658 = vmatmul.mubr.msk.bf16.gmra.mrb[8].mxu0 %vm613_vm0, %v1756_v18 }
  0xc8   : > { %688 = vmatprep.mubr.bf16.mxu0 %v1839_v5 }
  0xcf   : > { %1659 = vmatmul.mubr.msk.bf16.gmra.mrb[12].mxu0 %vm613_vm0, %v1757_v19 }
  0xd0   : > { %1253 = vmatprep.mubr.bf16.mxu0 %v1839_v5 }
 0x18a   : > { %v660_v21 = vpop.f32.mrb[0].mxu0 }
 0x18b   : > { %v661_v22 = vadd.f32 %v660_v21, %v556_v20  ;;  %v662_v23 = vpop.f32.mrb[1].mxu0 }
 0x18c   : > { %v663_v25 = vadd.f32 %v662_v23, %v556_v20  ;;  %v664_v26 = vpop.f32.mrb[2].mxu0 }
 0x18d   : > { %v665_v27 = vadd.f32 %v664_v26, %v561_v24  ;;  %v666_v28 = vpop.f32.mrb[3].mxu0  ;;  %v699_v30 = vmax.f32 %v661_v22, 0.0  ;;  %v1760_v26 = vld [vmem:[%s2343_s5 + $0x10] sm:$0xff]  }
 0x18e   : > { %v667_v29 = vadd.f32 %v666_v28, %v561_v24  ;;  %v700_v32 = vmax.f32 %v663_v25, 0.0  ;;  %v1758_v24 = vld [vmem:[%s2343_s5] sm:$0xff]   ;;  %v1759_v25 = vld [vmem:[%s2343_s5 + $0x8] sm:$0xff]  }
 0x18f   : > { %v701_v31 = vmax.f32 %v665_v27, 0.0  ;;  %v1761_v27 = vld [vmem:[%s2343_s5 + $0x18] sm:$0xff]   ;;  %v1762_v28 = vld [vmem:[%s2343_s5 + $0x20] sm:$0xff]  }
 0x190   : > { %v702_v33 = vmax.f32 %v667_v29, 0.0  ;;  %v1763_v29 = vld [vmem:[%s2343_s5 + $0x28] sm:$0xff]  }
 0x191   : > { %v715_v34 = vpack.c.bf16 %v701_v31, %v699_v30  ;;  %v1764_v30 = vld [vmem:[%s2343_s5 + $0x30] sm:$0xff]   ;;  %v1765_v31 = vld [vmem:[%s2343_s5 + $0x38] sm:$0xff]  }
 0x192   : > { %v670_v36 = vpop.f32.mrb[4].mxu0  ;;  %v716_v37 = vpack.c.bf16 %v702_v33, %v700_v32  ;;  %v758_v32 = vpop.permute.xlu0 %757 }
 0x193   : > { %v671_v38 = vadd.f32 %v670_v36, %v566_v35  ;;  %v672_v39 = vpop.f32.mrb[5].mxu0  ;;  %v763_v36 = vpop.permute.xlu1 %762 }
 0x194   : > { %v673_v41 = vadd.f32 %v672_v39, %v566_v35  ;;  %v674_v42 = vpop.f32.mrb[6].mxu0  ;;  %900 = vmatprep.subr.bf16.mxu1 %v716_v37 }
 0x195   : > { %v675_v43 = vadd.f32 %v674_v42, %v571_v40  ;;  %v676_v44 = vpop.f32.mrb[7].mxu0  ;;  %901 = vmatpush1.bf16.msra.mxu1 %v715_v34  ;;  %v703_v46 = vmax.f32 %v671_v38, 0.0 }
 0x196   : > { %v677_v45 = vadd.f32 %v676_v44, %v571_v40  ;;  %v704_v48 = vmax.f32 %v673_v41, 0.0 }
 0x197   : > { %v705_v47 = vmax.f32 %v675_v43, 0.0 }
 0x198   : > { %v706_v49 = vmax.f32 %v677_v45, 0.0 }
 0x199   : > { %v717_v50 = vpack.c.bf16 %v705_v47, %v703_v46  ;;  %v768_v47 = vpop.permute.xlu0 %767 }
 0x19a   : > { %v718_v52 = vpack.c.bf16 %v706_v49, %v704_v48  ;;  %v680_v53 = vpop.f32.mrb[8].mxu0 }
 0x19b   : > { %v681_v54 = vadd.f32 %v680_v53, %v576_v51  ;;  %v682_v55 = vpop.f32.mrb[9].mxu0 }
 0x19c   : > { %v683_v57 = vadd.f32 %v682_v55, %v576_v51  ;;  %v684_v58 = vpop.f32.mrb[10].mxu0  ;;  %902 = vmatprep.subr.bf16.mxu1 %v718_v52  ;;  %v773_v52 = vpop.permute.xlu1 %772 }
 0x19d   : > { %v685_v59 = vadd.f32 %v684_v58, %v581_v56  ;;  %v686_v60 = vpop.f32.mrb[11].mxu0  ;;  %903 = vmatpush1.bf16.msra.mxu1 %v717_v50  ;;  %v707_v63 = vmax.f32 %v681_v54, 0.0 }
 0x19e   : > { %v687_v61 = vadd.f32 %v686_v60, %v581_v56  ;;  %v708_v2 = vmax.f32 %v683_v57, 0.0 }
 0x19f   : > { %v709_v0 = vmax.f32 %v685_v59, 0.0 }
 0x1a0   : > { %v710_v4 = vmax.f32 %v687_v61, 0.0 }
 0x1a1   : > { %v719_v7 = vpack.c.bf16 %v709_v0, %v707_v63  ;;  %v778_v0 = vpop.permute.xlu0 %777 }
 0x1a2   : > { %v720_v3 = vpack.c.bf16 %v710_v4, %v708_v2  ;;  %v690_v9 = vpop.f32.mrb[12].mxu0 }
 0x1a3   : > { %v691_v10 = vadd.f32 %v690_v9, %v586_v8  ;;  %v692_v11 = vpop.f32.mrb[13].mxu0 }
 0x1a4   : > { %v693_v13 = vadd.f32 %v692_v11, %v586_v8  ;;  %v694_v14 = vpop.f32.mrb[14].mxu0  ;;  %904 = vmatprep.subr.bf16.mxu1 %v720_v3  ;;  %v783_v3 = vpop.permute.xlu1 %782 }
 0x1a5   : > { %v695_v15 = vadd.f32 %v694_v14, %v591_v12  ;;  %v696_v16 = vpop.f32.mrb[15].mxu0  ;;  %905 = vmatpush1.bf16.msra.mxu1 %v719_v7  ;;  %v711_v18 = vmax.f32 %v691_v10, 0.0 }
 0x1a6   : > { %v697_v17 = vadd.f32 %v696_v16, %v591_v12  ;;  %v712_v20 = vmax.f32 %v693_v13, 0.0 }
 0x1a7   : > { %v713_v19 = vmax.f32 %v695_v15, 0.0 }
 0x1a8   : > { %v714_v21 = vmax.f32 %v697_v17, 0.0 }
 0x1a9   : > { %v721_v22 = vpack.c.bf16 %v713_v19, %v711_v18  ;;  %v788_v19 = vpop.permute.xlu0 %787 }
 0x1aa   : > { %v722_v23 = vpack.c.bf16 %v714_v21, %v712_v20 }
 0x1ac   : > { %906 = vmatprep.subr.bf16.mxu1 %v722_v23 }
 0x1ad   : > { %907 = vmatpush1.bf16.msra.mxu1 %v721_v22 }
 0x1b0   : > { %1668 = vmatmul.mubr.msk.bf16.vlgmr.msra.gmra.mrb[0].mxu1 %vm875_vm1, %v1758_v24  ;;  %v793_v24 = vpop.permute.xlu1 %792 }
 0x1b1   : > { %942 = vmatprep.mubr.bf16.mxu1 %v1839_v5 }
 0x1b8   : > { %1669 = vmatmul.mubr.msk.bf16.gmra.mrb[4].mxu1 %vm875_vm1, %v1759_v25 }
 0x1b9   : > { %952 = vmatprep.mubr.bf16.mxu1 %v1839_v5 }
 0x1c0   : > { %1670 = vmatmul.mubr.msk.bf16.gmra.mrb[8].mxu1 %vm875_vm1, %v1760_v26 }
 0x1c1   : > { %962 = vmatprep.mubr.bf16.mxu1 %v1839_v5 }
 0x1c8   : > { %1671 = vmatmul.mubr.msk.bf16.gmra.mrb[12].mxu1 %vm875_vm1, %v1761_v27 }
 0x1c9   : > { %972 = vmatprep.mubr.bf16.mxu1 %v1839_v5 }
 0x1d0   : > { %1672 = vmatmul.mubr.msk.bf16.gmra.mrb[16].mxu1 %vm875_vm1, %v1762_v28 }
 0x1d1   : > { %982 = vmatprep.mubr.bf16.mxu1 %v1839_v5 }
 0x1d8   : > { %1673 = vmatmul.mubr.msk.bf16.gmra.mrb[20].mxu1 %vm875_vm1, %v1763_v29 }
 0x1d9   : > { %992 = vmatprep.mubr.bf16.mxu1 %v1839_v5 }
 0x1e0   : > { %1674 = vmatmul.mubr.msk.bf16.gmra.mrb[24].mxu1 %vm875_vm1, %v1764_v30 }
 0x1e1   : > { %1002 = vmatprep.mubr.bf16.mxu1 %v1839_v5 }
 0x1e8   : > { %1675 = vmatmul.mubr.msk.bf16.gmra.mrb[28].mxu1 %vm875_vm1, %v1765_v31 }
 0x1e9   : > { %1323 = vmatprep.mubr.bf16.mxu1 %v1839_v5 }
 0x283   : > { %v934_v33 = vpop.f32.mrb[0].mxu1 }
 0x284   : > { %v935_v34 = vadd.f32 %v934_v33, %v758_v32  ;;  %v936_v35 = vpop.f32.mrb[1].mxu1 }
 0x285   : > { %v937_v37 = vadd.f32 %v936_v35, %v758_v32  ;;  %v938_v38 = vpop.f32.mrb[2].mxu1  ;;  %v798_v35 = vpop.permute.xlu0 %797 }
 0x286   : > { %v939_v39 = vadd.f32 %v938_v38, %v763_v36  ;;  %v940_v40 = vpop.f32.mrb[3].mxu1  ;;  %v1013_v42 = vmax.f32 %v935_v34, 0.0 }
 0x287   : > { %v941_v41 = vadd.f32 %v940_v40, %v763_v36  ;;  %v1014_v44 = vmax.f32 %v937_v37, 0.0  ;;  %v803_v40 = vpop.permute.xlu1 %802 }
 0x288   : > { %v1015_v43 = vmax.f32 %v939_v39, 0.0 }
 0x289   : > { %v1016_v45 = vmax.f32 %v941_v41, 0.0 }
 0x28a   : > { %v1045_v46 = vpack.c.bf16 %v1015_v43, %v1013_v42 }
 0x28b   : > { %v1046_v48 = vpack.c.bf16 %v1016_v45, %v1014_v44  ;;  %v944_v49 = vpop.f32.mrb[4].mxu1 }
 0x28c   : > { %v945_v50 = vadd.f32 %v944_v49, %v768_v47  ;;  %v946_v51 = vpop.f32.mrb[5].mxu1 }
 0x28d   : > { %v947_v53 = vadd.f32 %v946_v51, %v768_v47  ;;  %v948_v54 = vpop.f32.mrb[6].mxu1  ;;  %1221 = vmatprep.subr.bf16.mxu0 %v1046_v48  ;;  %1690 = vmatprep.subr.bf16.mxu1 %v1046_v48  ;;  %v808_v51 = vpop.permute.xlu0 %807 }
 0x28e   : > { %v949_v55 = vadd.f32 %v948_v54, %v773_v52  ;;  %v950_v56 = vpop.f32.mrb[7].mxu1  ;;  %1222 = vmatpush1.bf16.msra.mxu0 %v1045_v46  ;;  %1698 = vmatpush1.bf16.msra.mxu1 %v1045_v46  ;;  %v1017_v58 = vmax.f32 %v945_v50, 0.0 }
 0x28f   : > { %v951_v57 = vadd.f32 %v950_v56, %v773_v52  ;;  %v1018_v60 = vmax.f32 %v947_v53, 0.0  ;;  %v813_v56 = vpop.permute.xlu1 %812 }
 0x290   : > { %v1019_v59 = vmax.f32 %v949_v55, 0.0 }
 0x291   : > { %v1020_v61 = vmax.f32 %v951_v57, 0.0 }
 0x292   : > { %v1047_v63 = vpack.c.bf16 %v1019_v59, %v1017_v58 }
 0x293   : > { %v1048_v2 = vpack.c.bf16 %v1020_v61, %v1018_v60  ;;  %v954_v4 = vpop.f32.mrb[8].mxu1 }
 0x294   : > { %v955_v7 = vadd.f32 %v954_v4, %v778_v0  ;;  %v956_v8 = vpop.f32.mrb[9].mxu1 }
 0x295   : > { %v957_v9 = vadd.f32 %v956_v8, %v778_v0  ;;  %v958_v10 = vpop.f32.mrb[10].mxu1  ;;  %1223 = vmatprep.subr.bf16.mxu0 %v1048_v2  ;;  %1691 = vmatprep.subr.bf16.mxu1 %v1048_v2  ;;  %v818_v8 = vpop.permute.xlu0 %817 }
 0x296   : > { %v959_v11 = vadd.f32 %v958_v10, %v783_v3  ;;  %v960_v12 = vpop.f32.mrb[11].mxu1  ;;  %1224 = vmatpush1.bf16.msra.mxu0 %v1047_v63  ;;  %1699 = vmatpush1.bf16.msra.mxu1 %v1047_v63  ;;  %v1021_v14 = vmax.f32 %v955_v7, 0.0 }
 0x297   : > { %v961_v13 = vadd.f32 %v960_v12, %v783_v3  ;;  %v1022_v16 = vmax.f32 %v957_v9, 0.0  ;;  %v823_v12 = vpop.permute.xlu1 %822 }
 0x298   : > { %v1023_v15 = vmax.f32 %v959_v11, 0.0 }
 0x299   : > { %v1024_v17 = vmax.f32 %v961_v13, 0.0 }
 0x29a   : > { %v1049_v18 = vpack.c.bf16 %v1023_v15, %v1021_v14 }
 0x29b   : > { %v1050_v20 = vpack.c.bf16 %v1024_v17, %v1022_v16  ;;  %v964_v21 = vpop.f32.mrb[12].mxu1 }
 0x29c   : > { %v965_v22 = vadd.f32 %v964_v21, %v788_v19  ;;  %v966_v23 = vpop.f32.mrb[13].mxu1 }
 0x29d   : > { %v967_v25 = vadd.f32 %v966_v23, %v788_v19  ;;  %v968_v26 = vpop.f32.mrb[14].mxu1  ;;  %1225 = vmatprep.subr.bf16.mxu0 %v1050_v20  ;;  %1692 = vmatprep.subr.bf16.mxu1 %v1050_v20  ;;  %v828_v23 = vpop.permute.xlu0 %827 }
 0x29e   : > { %v969_v27 = vadd.f32 %v968_v26, %v793_v24  ;;  %v970_v28 = vpop.f32.mrb[15].mxu1  ;;  %1226 = vmatpush1.bf16.msra.mxu0 %v1049_v18  ;;  %1700 = vmatpush1.bf16.msra.mxu1 %v1049_v18  ;;  %v1025_v30 = vmax.f32 %v965_v22, 0.0 }
 0x29f   : > { %v971_v29 = vadd.f32 %v970_v28, %v793_v24  ;;  %v1026_v32 = vmax.f32 %v967_v25, 0.0  ;;  %v833_v28 = vpop.permute.xlu1 %832 }
 0x2a0   : > { %v1027_v31 = vmax.f32 %v969_v27, 0.0 }
 0x2a1   : > { %v1028_v33 = vmax.f32 %v971_v29, 0.0 }
 0x2a2   : > { %v1051_v34 = vpack.c.bf16 %v1027_v31, %v1025_v30 }
 0x2a3   : > { %v1052_v36 = vpack.c.bf16 %v1028_v33, %v1026_v32  ;;  %v974_v37 = vpop.f32.mrb[16].mxu1 }
 0x2a4   : > { %v975_v38 = vadd.f32 %v974_v37, %v798_v35  ;;  %v976_v39 = vpop.f32.mrb[17].mxu1 }
 0x2a5   : > { %v977_v41 = vadd.f32 %v976_v39, %v798_v35  ;;  %v978_v42 = vpop.f32.mrb[18].mxu1  ;;  %1227 = vmatprep.subr.bf16.mxu0 %v1052_v36  ;;  %1693 = vmatprep.subr.bf16.mxu1 %v1052_v36 }
 0x2a6   : > { %v979_v43 = vadd.f32 %v978_v42, %v803_v40  ;;  %v980_v44 = vpop.f32.mrb[19].mxu1  ;;  %1228 = vmatpush1.bf16.msra.mxu0 %v1051_v34  ;;  %1701 = vmatpush1.bf16.msra.mxu1 %v1051_v34  ;;  %v1029_v46 = vmax.f32 %v975_v38, 0.0  ;;  %v1768_v42 = vld [vmem:[%s2345_s7 + $0x8] sm:$0xff]  }
 0x2a7   : > { %v981_v45 = vadd.f32 %v980_v44, %v803_v40  ;;  %v1030_v48 = vmax.f32 %v977_v41, 0.0  ;;  %v1766_v40 = vld [vmem:[%s2345_s7] sm:$0xff]   ;;  %v1767_v41 = vld [vmem:[%s2345_s7 + $0x38] sm:$0xff]  }
 0x2a8   : > { %v1031_v47 = vmax.f32 %v979_v43, 0.0  ;;  %v1769_v43 = vld [vmem:[%s2345_s7 + $0x10] sm:$0xff]   ;;  %v1770_v44 = vld [vmem:[%s2345_s7 + $0x18] sm:$0xff]  }
 0x2a9   : > { %v1032_v49 = vmax.f32 %v981_v45, 0.0  ;;  %v1771_v45 = vld [vmem:[%s2345_s7 + $0x20] sm:$0xff]  }
 0x2aa   : > { %v1053_v50 = vpack.c.bf16 %v1031_v47, %v1029_v46  ;;  %v1772_v46 = vld [vmem:[%s2345_s7 + $0x28] sm:$0xff]   ;;  %v1773_v47 = vld [vmem:[%s2345_s7 + $0x30] sm:$0xff]  }
 0x2ab   : > { %v1054_v52 = vpack.c.bf16 %v1032_v49, %v1030_v48  ;;  %v984_v53 = vpop.f32.mrb[20].mxu1  ;;  %v1096_v48 = vpop.permute.xlu0 %1095 }
 0x2ac   : > { %v985_v54 = vadd.f32 %v984_v53, %v808_v51  ;;  %v986_v55 = vpop.f32.mrb[21].mxu1  ;;  %v1101_v49 = vpop.permute.xlu1 %1100 }
 0x2ad   : > { %v987_v57 = vadd.f32 %v986_v55, %v808_v51  ;;  %v988_v58 = vpop.f32.mrb[22].mxu1  ;;  %1229 = vmatprep.subr.bf16.mxu0 %v1054_v52  ;;  %1694 = vmatprep.subr.bf16.mxu1 %v1054_v52 }
 0x2ae   : > { %v989_v59 = vadd.f32 %v988_v58, %v813_v56  ;;  %v990_v60 = vpop.f32.mrb[23].mxu1  ;;  %1230 = vmatpush1.bf16.msra.mxu0 %v1053_v50  ;;  %1702 = vmatpush1.bf16.msra.mxu1 %v1053_v50  ;;  %v1033_v63 = vmax.f32 %v985_v54, 0.0 }
 0x2af   : > { %v991_v61 = vadd.f32 %v990_v60, %v813_v56  ;;  %v1034_v2 = vmax.f32 %v987_v57, 0.0  ;;  %v1106_v50 = vpop.permute.xlu0 %1105 }
 0x2b0   : > { %v1035_v0 = vmax.f32 %v989_v59, 0.0  ;;  %v1111_v51 = vpop.permute.xlu1 %1110 }
 0x2b1   : > { %v1036_v4 = vmax.f32 %v991_v61, 0.0 }
 0x2b2   : > { %v1055_v7 = vpack.c.bf16 %v1035_v0, %v1033_v63 }
 0x2b3   : > { %v1056_v3 = vpack.c.bf16 %v1036_v4, %v1034_v2  ;;  %v994_v9 = vpop.f32.mrb[24].mxu1  ;;  %v1385_v52 = vpop.permute.xlu0 %1384 }
 0x2b4   : > { %v995_v10 = vadd.f32 %v994_v9, %v818_v8  ;;  %v996_v11 = vpop.f32.mrb[25].mxu1  ;;  %v1390_v53 = vpop.permute.xlu1 %1389 }
 0x2b5   : > { %v997_v13 = vadd.f32 %v996_v11, %v818_v8  ;;  %v998_v14 = vpop.f32.mrb[26].mxu1  ;;  %1231 = vmatprep.subr.bf16.mxu0 %v1056_v3  ;;  %1695 = vmatprep.subr.bf16.mxu1 %v1056_v3 }
 0x2b6   : > { %v999_v15 = vadd.f32 %v998_v14, %v823_v12  ;;  %v1000_v16 = vpop.f32.mrb[27].mxu1  ;;  %1232 = vmatpush1.bf16.msra.mxu0 %v1055_v7  ;;  %1703 = vmatpush1.bf16.msra.mxu1 %v1055_v7  ;;  %v1037_v18 = vmax.f32 %v995_v10, 0.0 }
 0x2b7   : > { %v1001_v17 = vadd.f32 %v1000_v16, %v823_v12  ;;  %v1038_v20 = vmax.f32 %v997_v13, 0.0  ;;  %v1116_v54 = vpop.permute.xlu0 %1115 }
 0x2b8   : > { %v1039_v19 = vmax.f32 %v999_v15, 0.0  ;;  %v1395_v55 = vpop.permute.xlu1 %1394 }
 0x2b9   : > { %v1040_v21 = vmax.f32 %v1001_v17, 0.0 }
 0x2ba   : > { %v1057_v22 = vpack.c.bf16 %v1039_v19, %v1037_v18 }
 0x2bb   : > { %v1058_v24 = vpack.c.bf16 %v1040_v21, %v1038_v20  ;;  %v1004_v25 = vpop.f32.mrb[28].mxu1  ;;  %v1121_v56 = vpop.permute.xlu0 %1120 }
 0x2bc   : > { %v1005_v26 = vadd.f32 %v1004_v25, %v828_v23  ;;  %v1006_v27 = vpop.f32.mrb[29].mxu1  ;;  %v1400_v57 = vpop.permute.xlu1 %1399 }
 0x2bd   : > { %v1007_v29 = vadd.f32 %v1006_v27, %v828_v23  ;;  %v1008_v30 = vpop.f32.mrb[30].mxu1  ;;  %1233 = vmatprep.subr.bf16.mxu0 %v1058_v24  ;;  %1696 = vmatprep.subr.bf16.mxu1 %v1058_v24 }
 0x2be   : > { %v1009_v31 = vadd.f32 %v1008_v30, %v833_v28  ;;  %v1010_v32 = vpop.f32.mrb[31].mxu1  ;;  %1234 = vmatpush1.bf16.msra.mxu0 %v1057_v22  ;;  %1704 = vmatpush1.bf16.msra.mxu1 %v1057_v22  ;;  %v1041_v34 = vmax.f32 %v1005_v26, 0.0 }
 0x2bf   : > { %v1011_v33 = vadd.f32 %v1010_v32, %v833_v28  ;;  %v1042_v36 = vmax.f32 %v1007_v29, 0.0  ;;  %v2252_v58 = vpop.permute.xlu0 %1125 }
 0x2c0   : > { %v1043_v35 = vmax.f32 %v1009_v31, 0.0  ;;  %v2254_v59 = vpop.permute.xlu1 %1404 }
 0x2c1   : > { %v1044_v37 = vmax.f32 %v1011_v33, 0.0 }
 0x2c2   : > { %v1059_v38 = vpack.c.bf16 %v1043_v35, %v1041_v34 }
 0x2c3   : > { %v1060_v39 = vpack.c.bf16 %v1044_v37, %v1042_v36 }
 0x2c4   : > { %v1410_v12 = vpop.permute.xlu1 %1409 }
 0x2c5   : > { %1235 = vmatprep.subr.bf16.mxu0 %v1060_v39  ;;  %1697 = vmatprep.subr.bf16.mxu1 %v1060_v39 }
 0x2c6   : > { %1236 = vmatpush1.bf16.msra.mxu0 %v1059_v38  ;;  %1705 = vmatpush1.bf16.msra.mxu1 %v1059_v38 }
 0x2c8   : > { %v1415_v26 = vpop.permute.xlu1 %1414 }
 0x2c9   : > { %1254 = vmatmul.mubr.bf16.vlgmr.msra.gmra.mrb[16].mxu0 %v1766_v40  ;;  %1324 = vmatmul.mubr.bf16.vlgmr.msra.gmra.mrb[32].mxu1 %v1767_v41 }
 0x2ca   : > { %1263 = vmatprep.mubr.bf16.mxu0 %v1839_v5 }
 0x2d1   : > { %1264 = vmatmul.mubr.bf16.gmra.mrb[20].mxu0 %v1768_v42  ;;  %v1420_v42 = vpop.permute.xlu1 %1419 }
 0x2d2   : > { %1273 = vmatprep.mubr.bf16.mxu0 %v1839_v5 }
 0x2d9   : > { %1274 = vmatmul.mubr.bf16.gmra.mrb[24].mxu0 %v1769_v43 }
 0x2da   : > { %1283 = vmatprep.mubr.bf16.mxu0 %v1839_v5 }
 0x2e1   : > { %1284 = vmatmul.mubr.bf16.gmra.mrb[28].mxu0 %v1770_v44 }
 0x2e2   : > { %1293 = vmatprep.mubr.bf16.mxu0 %v1839_v5 }
 0x2e9   : > { %1294 = vmatmul.mubr.bf16.gmra.mrb[32].mxu0 %v1771_v45 }
 0x2ea   : > { %1303 = vmatprep.mubr.bf16.mxu0 %v1839_v5 }
 0x2f1   : > { %1304 = vmatmul.mubr.bf16.gmra.mrb[36].mxu0 %v1772_v46 }
 0x2f2   : > { %1313 = vmatprep.mubr.bf16.mxu0 %v1839_v5  ;;  %v2256_v5 = vpop.permute.xlu0 %1130 }
 0x2f6   : > { %v2266_v19 = vpop.permute.xlu0 %1135 }
 0x2f9   : > { %1314 = vmatmul.mubr.bf16.gmra.mrb[40].mxu0 %v1773_v47 }
 0x2fa   : > { %v2268_v37 = vpop.permute.xlu0 %1140 }
 0x39c   : > { %v1255_v60 = vpop.f32.mrb[16].mxu0  ;;  %v2258_v61 = vpop.f32.mrb[32].mxu1 }
 0x39d   : > { %v1256_v63 = vadd.f32 %v1255_v60, %v1096_v48  ;;  %v1257_v0 = vpop.f32.mrb[17].mxu0  ;;  %v2260_v2 = vpop.f32.mrb[33].mxu1 }
 0x39e   : > { %v1258_v4 = vadd.f32 %v1257_v0, %v1096_v48  ;;  %v1259_v7 = vpop.f32.mrb[18].mxu0  ;;  %v2262_v8 = vpop.f32.mrb[34].mxu1 }
 0x39f   : > { %v1334_v3 = vmax.f32 %v1256_v63, 0.0  ;;  %v1260_v9 = vadd.f32 %v1259_v7, %v1101_v49  ;;  %v1261_v10 = vpop.f32.mrb[19].mxu0  ;;  %v2264_v11 = vpop.f32.mrb[35].mxu1 }
 0x3a0   : > { %v1335_v13 = vmax.f32 %v1258_v4, 0.0  ;;  %v1262_v14 = vadd.f32 %v1261_v10, %v1101_v49  ;;  %v2270_v63 = vpop.permute.xlu0 %1145 }
 0x3a1   : > { %v1336_v15 = vmax.f32 %v1260_v9, 0.0  ;;  %v1462_v17 = vmul.f32 %v1385_v52, %v1334_v3  ;;  %v1425_v3 = vpop.permute.xlu1 %1424 }
 0x3a2   : > { %v1337_v16 = vmax.f32 %v1262_v14, 0.0  ;;  %v1463_v20 = vmul.f32 %v1385_v52, %v1335_v13 }
 0x3a3   : > { %v1464_v18 = vmul.f32 %v1390_v53, %v1336_v15 }
 0x3a4   : > { %v1465_v21 = vmul.f32 %v1390_v53, %v1337_v16  ;;  %v1265_v22 = vpop.f32.mrb[20].mxu0 }
 0x3a5   : > { %v1494_v23 = vadd.f32 %v1464_v18, %v1462_v17  ;;  %v1266_v24 = vadd.f32 %v1265_v22, %v1106_v50  ;;  %v1267_v25 = vpop.f32.mrb[21].mxu0 }
 0x3a6   : > { %v1515_v27 = vadd.f32 %v1465_v21, %v1463_v20  ;;  %v1268_v28 = vadd.f32 %v1267_v25, %v1106_v50  ;;  %v1269_v29 = vpop.f32.mrb[22].mxu0  ;;  %v1151_v20 = vpop.permute.xlu0 %1150 }
 0x3a7   : > { %v1338_v30 = vmax.f32 %v1266_v24, 0.0  ;;  %v1270_v31 = vadd.f32 %v1269_v29, %v1111_v51  ;;  %v1271_v32 = vpop.f32.mrb[23].mxu0 }
 0x3a8   : > { %v1339_v33 = vmax.f32 %v1268_v28, 0.0  ;;  %v1272_v34 = vadd.f32 %v1271_v32, %v1111_v51 }
 0x3a9   : > { %v1466_v35 = vmul.f32 %v1395_v55, %v1338_v30  ;;  %v1340_v36 = vmax.f32 %v1270_v31, 0.0 }
 0x3aa   : > { %v1467_v38 = vmul.f32 %v1395_v55, %v1339_v33  ;;  %v1341_v39 = vmax.f32 %v1272_v34, 0.0  ;;  %v1156_v34 = vpop.permute.xlu0 %1155 }
 0x3ab   : > { %v1495_v40 = vadd.f32 %v1494_v23, %v1466_v35  ;;  %v1468_v41 = vmul.f32 %v1400_v57, %v1340_v36 }
 0x3ac   : > { %v1516_v43 = vadd.f32 %v1515_v27, %v1467_v38  ;;  %v1469_v44 = vmul.f32 %v1400_v57, %v1341_v39  ;;  %v1275_v45 = vpop.f32.mrb[24].mxu0 }
 0x3ad   : > { %v1496_v46 = vadd.f32 %v1495_v40, %v1468_v41  ;;  %v1276_v47 = vadd.f32 %v1275_v45, %v1116_v54  ;;  %v1277_v48 = vpop.f32.mrb[25].mxu0 }
 0x3ae   : > { %v1517_v49 = vadd.f32 %v1516_v43, %v1469_v44  ;;  %v1278_v50 = vadd.f32 %v1277_v48, %v1116_v54  ;;  %v1279_v52 = vpop.f32.mrb[26].mxu0 }
 0x3af   : > { %v1342_v53 = vmax.f32 %v1276_v47, 0.0  ;;  %v1280_v51 = vadd.f32 %v1279_v52, %v1121_v56  ;;  %v1281_v60 = vpop.f32.mrb[27].mxu0 }
 0x3b0   : > { %v1343_v0 = vmax.f32 %v1278_v50, 0.0  ;;  %v1282_v55 = vadd.f32 %v1281_v60, %v1121_v56 }
 0x3b1   : > { %v1470_v4 = vmul.f32 %v2254_v59, %v1342_v53  ;;  %v1344_v7 = vmax.f32 %v1280_v51, 0.0 }
 0x3b2   : > { %v1471_v57 = vmul.f32 %v2254_v59, %v1343_v0  ;;  %v1345_v9 = vmax.f32 %v1282_v55, 0.0  ;;  %v1430_v59 = vpop.permute.xlu1 %1429 }
 0x3b3   : > { %v1497_v10 = vadd.f32 %v1496_v46, %v1470_v4  ;;  %v1472_v13 = vmul.f32 %v1410_v12, %v1344_v7 }
 0x3b4   : > { %v1518_v14 = vadd.f32 %v1517_v49, %v1471_v57  ;;  %v1473_v15 = vmul.f32 %v1410_v12, %v1345_v9  ;;  %v1285_v54 = vpop.f32.mrb[28].mxu0 }
 0x3b5   : > { %v1498_v16 = vadd.f32 %v1497_v10, %v1472_v13  ;;  %v1286_v17 = vadd.f32 %v1285_v54, %v2252_v58  ;;  %v1287_v18 = vpop.f32.mrb[29].mxu0 }
 0x3b6   : > { %v1519_v21 = vadd.f32 %v1518_v14, %v1473_v15  ;;  %v1288_v56 = vadd.f32 %v1287_v18, %v2252_v58  ;;  %v1289_v22 = vpop.f32.mrb[30].mxu0  ;;  %v1435_v41 = vpop.permute.xlu1 %1434 }
 0x3b7   : > { %v1346_v23 = vmax.f32 %v1286_v17, 0.0  ;;  %v1290_v24 = vadd.f32 %v1289_v22, %v2256_v5  ;;  %v1291_v25 = vpop.f32.mrb[31].mxu0 }
 0x3b8   : > { %v1347_v27 = vmax.f32 %v1288_v56, 0.0  ;;  %v1292_v28 = vadd.f32 %v1291_v25, %v2256_v5 }
 0x3b9   : > { %v1474_v29 = vmul.f32 %v1415_v26, %v1346_v23  ;;  %v1348_v12 = vmax.f32 %v1290_v24, 0.0 }
 0x3ba   : > { %v1475_v30 = vmul.f32 %v1415_v26, %v1347_v27  ;;  %v1349_v31 = vmax.f32 %v1292_v28, 0.0  ;;  %v1440_v0 = vpop.permute.xlu1 %1439 }
 0x3bb   : > { %v1499_v32 = vadd.f32 %v1498_v16, %v1474_v29  ;;  %v1476_v33 = vmul.f32 %v1420_v42, %v1348_v12 }
 0x3bc   : > { %v1520_v35 = vadd.f32 %v1519_v21, %v1475_v30  ;;  %v1477_v36 = vmul.f32 %v1420_v42, %v1349_v31  ;;  %v1295_v38 = vpop.f32.mrb[32].mxu0  ;;  %v1161_v42 = vpop.permute.xlu0 %1160 }
 0x3bd   : > { %v1500_v58 = vadd.f32 %v1499_v32, %v1476_v33  ;;  %v1296_v39 = vadd.f32 %v1295_v38, %v2266_v19  ;;  %v1297_v40 = vpop.f32.mrb[33].mxu0 }
 0x3be   : > { %v1521_v43 = vadd.f32 %v1520_v35, %v1477_v36  ;;  %v1298_v44 = vadd.f32 %v1297_v40, %v2266_v19  ;;  %v1299_v45 = vpop.f32.mrb[34].mxu0  ;;  %v1445_v56 = vpop.permute.xlu1 %1444 }
 0x3bf   : > { %v1350_v5 = vmax.f32 %v1296_v39, 0.0  ;;  %v1300_v46 = vadd.f32 %v1299_v45, %v2268_v37  ;;  %v1301_v26 = vpop.f32.mrb[35].mxu0 }
 0x3c0   : > { %v1351_v47 = vmax.f32 %v1298_v44, 0.0  ;;  %v1302_v48 = vadd.f32 %v1301_v26, %v2268_v37  ;;  %v1166_v16 = vpop.permute.xlu0 %1165 }
 0x3c1   : > { %v1478_v49 = vmul.f32 %v1425_v3, %v1350_v5  ;;  %v1352_v50 = vmax.f32 %v1300_v46, 0.0  ;;  %v1326_v29 = vadd.f32 %v2258_v61, %v1166_v16  ;;  %v1328_v32 = vadd.f32 %v2260_v2, %v1166_v16 }
 0x3c2   : > { %v1479_v52 = vmul.f32 %v1425_v3, %v1351_v47  ;;  %v1353_v53 = vmax.f32 %v1302_v48, 0.0  ;;  %v1450_v40 = vpop.permute.xlu1 %1449 }
 0x3c3   : > { %v1501_v51 = vadd.f32 %v1500_v58, %v1478_v49  ;;  %v1480_v60 = vmul.f32 %v1430_v59, %v1352_v50  ;;  %v1362_v61 = vmax.f32 %v1326_v29, 0.0  ;;  %v1363_v46 = vmax.f32 %v1328_v32, 0.0 }
 0x3c4   : > { %v1522_v55 = vadd.f32 %v1521_v43, %v1479_v52  ;;  %v1481_v4 = vmul.f32 %v1430_v59, %v1353_v53  ;;  %v1305_v7 = vpop.f32.mrb[36].mxu0  ;;  %v1171_v31 = vpop.permute.xlu0 %1170 }
 0x3c5   : > { %v1502_v19 = vadd.f32 %v1501_v51, %v1480_v60  ;;  %v1306_v57 = vadd.f32 %v1305_v7, %v2270_v63  ;;  %v1307_v9 = vpop.f32.mrb[37].mxu0  ;;  %v1330_v36 = vadd.f32 %v2262_v8, %v1171_v31 }
 0x3c6   : > { %v1523_v10 = vadd.f32 %v1522_v55, %v1481_v4  ;;  %v1308_v13 = vadd.f32 %v1307_v9, %v2270_v63  ;;  %v1309_v14 = vpop.f32.mrb[38].mxu0  ;;  %v1460_v60 = vpop.permute.xlu1 %1459 }
 0x3c7   : > { %v1354_v37 = vmax.f32 %v1306_v57, 0.0  ;;  %v1310_v15 = vadd.f32 %v1309_v14, %v1151_v20  ;;  %v1311_v54 = vpop.f32.mrb[39].mxu0  ;;  %v1364_v2 = vmax.f32 %v1330_v36, 0.0 }
 0x3c8   : > { %v1355_v3 = vmax.f32 %v1308_v13, 0.0  ;;  %v1312_v17 = vadd.f32 %v1311_v54, %v1151_v20  ;;  %v1455_v49 = vpop.permute.xlu0 %1454  ;;  %v1840_v54 = vmov 1966171168  }
 0x3c9   : > { %v1482_v18 = vmul.f32 %v1435_v41, %v1354_v37  ;;  %v1356_v21 = vmax.f32 %v1310_v15, 0.0  ;;  %v1490_v53 = vmul.f32 %v1455_v49, %v1362_v61  ;;  %v1492_v55 = vmul.f32 %v1460_v60, %v1364_v2 }
 0x3ca   : > { %v1483_v22 = vmul.f32 %v1435_v41, %v1355_v3  ;;  %v1357_v23 = vmax.f32 %v1312_v17, 0.0  ;;  %v1332_v41 = vadd.f32 %v2264_v11, %v1171_v31  ;;  %v1552_v16 = vunpack.c.l.s4 %v1840_v54 }
 0x3cb   : > { %v1503_v24 = vadd.f32 %v1502_v19, %v1482_v18  ;;  %v1484_v25 = vmul.f32 %v1440_v0, %v1356_v21 }
 0x3cc   : > { %v1524_v59 = vadd.f32 %v1523_v10, %v1483_v22  ;;  %v1485_v27 = vmul.f32 %v1440_v0, %v1357_v23  ;;  %v1315_v28 = vpop.f32.mrb[40].mxu0  ;;  %v1365_v50 = vmax.f32 %v1332_v41, 0.0  ;;  %v1491_v0 = vmul.f32 %v1455_v49, %v1363_v46  ;;  %v1540_v17 = vpop.permute.xlu0 %1539 }
 0x3cd   : > { %v1504_v63 = vadd.f32 %v1503_v24, %v1484_v25  ;;  %v1316_v12 = vadd.f32 %v1315_v28, %v1156_v34  ;;  %v1317_v30 = vpop.f32.mrb[41].mxu0  ;;  %v1553_v22 = vunpack.c.0.s8 %v1552_v16  ;;  %v1545_v23 = vrot.slane %v1540_v17, %v2152_v6 }
 0x3ce   : > { %v1525_v33 = vadd.f32 %v1524_v59, %v1485_v27  ;;  %v1318_v20 = vadd.f32 %v1317_v30, %v1156_v34  ;;  %v1319_v35 = vpop.f32.mrb[42].mxu0  ;;  %v1493_v4 = vmul.f32 %v1460_v60, %v1365_v50 }
 0x3cf   : > { %v1358_v38 = vmax.f32 %v1316_v12, 0.0  ;;  %v1320_v58 = vadd.f32 %v1319_v35, %v1161_v42  ;;  %v1321_v39 = vpop.f32.mrb[43].mxu0  ;;  %v1556_v28 = vsub.s32 %v1553_v22, %v2143_v1 }
 0x3d0   : > { %v1359_v43 = vmax.f32 %v1318_v20, 0.0  ;;  %v1322_v44 = vadd.f32 %v1321_v39, %v1161_v42 }
 0x3d1   : > { %v1486_v45 = vmul.f32 %v1445_v56, %v1358_v38  ;;  %v1360_v5 = vmax.f32 %v1320_v58, 0.0 }
 0x3d2   : > { %v1487_v26 = vmul.f32 %v1445_v56, %v1359_v43  ;;  %v1361_v47 = vmax.f32 %v1322_v44, 0.0 }
 0x3d3   : > { %v1505_v48 = vadd.f32 %v1504_v63, %v1486_v45  ;;  %v1488_v34 = vmul.f32 %v1450_v40, %v1360_v5 }
 0x3d4   : > { %v1526_v8 = vadd.f32 %v1525_v33, %v1487_v26  ;;  %v1489_v52 = vmul.f32 %v1450_v40, %v1361_v47 }
 0x3d5   : > { %v1506_v51 = vadd.f32 %v1505_v48, %v1488_v34 }
 0x3d6   : > { %v1527_v11 = vadd.f32 %v1526_v8, %v1489_v52 }
 0x3d7   : > { %v1507_v42 = vadd.f32 %v1506_v51, %v1490_v53 }
 0x3d8   : > { %v1528_v7 = vadd.f32 %v1527_v11, %v1491_v0 }
 0x3d9   : > { %v1508_v19 = vadd.f32 %v1507_v42, %v1492_v55 }
 0x3da   : > { %v1529_v57 = vadd.f32 %v1528_v7, %v1493_v4 }
 0x3db   : > { %v1509_v9 = vrot.slane %v1508_v19, 4 }
 0x3dc   : > { %v1530_v10 = vrot.slane %v1529_v57, 4 }
 0x3dd   : > { %v1510_v13 = vadd.f32 %v1509_v9, %v1508_v19 }
 0x3de   : > { %v1531_v14 = vadd.f32 %v1530_v10, %v1529_v57 }
 0x3df   : > { %v1511_v37 = vrot.slane %v1510_v13, 2 }
 0x3e0   : > { %v1532_v15 = vrot.slane %v1531_v14, 2 }
 0x3e1   : > { %v1512_v3 = vadd.f32 %v1511_v37, %v1510_v13 }
 0x3e2   : > { %v1533_v18 = vadd.f32 %v1532_v15, %v1531_v14 }
 0x3e3   : > { %v1513_v21 = vrot.slane %v1512_v3, 1 }
 0x3e4   : > { %v1534_v56 = vrot.slane %v1533_v18, 1 }
 0x3e5   : > { %v1514_v24 = vadd.f32 %v1513_v21, %v1512_v3 }
 0x3e6   : > { %v1535_v25 = vadd.f32 %v1534_v56, %v1533_v18 }
 0x3e7   : > { %v1546_v59 = vadd.f32 %v1545_v23, %v1514_v24 }
 0x3e8   : > { %v1547_v27 = vadd.f32 %v1545_v23, %v1535_v25 }
 0x3ea   : > { %v1550_v29 = vcombine.low %v1546_v59, %v1547_v27 }
 0x3ec   : > { %v1557_v63 = vrot.slane %v1550_v29, %v1556_v28 }
 0x3ee   : > { %v1564_v12 = vrot.slane %v1557_v63, %v1556_v28 }
 0x3f0   : > { %1570 = vst.msk [vmem:[%s382_s12] sm:$0x3] %vm1568_vm2, %v1564_v12 }
 0x3f1   : > { %1787 = shalt.err (!%p1784_p3)
}
 0x3f2   : > { %s1788_s30 = scalar_lea.hbm %s2296_s16, 32  ;;  %s1792_s14 = scalar_lea.hbm %s2349_s11, 64 }
 0x3f3   : > { %p1789_p4 = scmp.ne.s32.totalorder %s2296_s16, %s1788_s30  ;;  %p1793_p9 = scmp.lt.u32.totalorder %s2296_s16, %s2349_s11 }
 0x3f4   : > { %p1794_p10 = scmp.lt.u32.totalorder %s1792_s14, %s1788_s30  ;;  %p1796_p12 = scmp.lt.u32.totalorder %s1788_s30, %s2296_s16 }
 0x3f5   : > { %p1790_p7 = pnand %p1789_p4, %p1943_p5 }
 0x3f6   : > { %p1795_p11 = por %p1794_p10, %p1793_p9 }
 0x3f7   : > { %p1791_p8 = pneg %p1790_p7 }
 0x3f8   : > { %p1797_p13 = por %p1796_p12, %p1795_p11 }
 0x3fa   : > { %p1798_p0 = pnand %p1797_p13, %p1791_p8 }
 0x3fc   : > { %1801 = shalt.err (!%p1798_p0)
}
 0x3fd   : > { %1706 = dma.vmem_to_hbm [thread:$0]  (%p1943_p5), %s2298_s13, 32, %s2296_s16, %s1572_s17  }
 0x3fe PF: > { %p1712_p1 = scmp.ge.s32.totalorder %s1836_s22, 2  ;;  %s1598_s18 = sand.u32 1, %s1824_s19  }
 0x3ff   : > { %s1599_s23 = scalar_lea.sflag [#allocation4], %s1598_s18 }
 0x400   : > { %p1709_p2 = pnand %p1712_p1, %p1947_p6 }
 0x402   : > { %1819 = dma.done.wait (!%p1709_p2), %s1599_s23, 32  }
 0x403   : > { %1821 = vsyncadd (!%p1709_p2), %s1599_s23, 4294967264  ;;  %p23_p3 = scmp.ge.s32.totalorder %s1930_s24, 4   ;;  %s2352_s19 = smov %s1828_s20 }
 0x404   : > { %s2353_s20 = smov %s1832_s21  ;;  %s2354_s21 = smov %s1941_s27 }
 0x405   : > { %s2355_s22 = smov %s1930_s24  ;;  %25 = sbr.rel (!%p23_p3) target bundleno = 6 (0x6), region = 99 }
 0x40c   :  { %1604 = vsyncpa [#allocation4], 1 }
 0x40d   :  { %1606 = vsyncpa [#allocation4 + $0x1], 1 }

</bundles_post_ra>
